<compile_context>
chip_gen: v7x
topology: tpu7x:2x2x1
jax: 0.10.0
libtpu: 0.0.40
codegen_flags: <defaults>
</compile_context>

<pallas_src>
import functools

import jax
import jax.numpy as jnp
from jax.experimental import pallas as pl
from jax.experimental.pallas import tpu as pltpu

IGNORE_INDEX = -100


def _round_up(x, m):
    return (x + m - 1) // m * m


def _ce_kernel(logits_ref, tgt_ref, loss_ref, m_sc, s_sc, t_sc, *,
               n_classes, tile_c, chunk_c, mask_cols):
    """One (tn, tile_c) logits tile; chunked online logsumexp over classes."""
    ci = pl.program_id(1)

    @pl.when(ci == 0)
    def _init():
        m_sc[...] = jnp.full_like(m_sc, -jnp.inf)
        s_sc[...] = jnp.zeros_like(s_sc)
        t_sc[...] = jnp.zeros_like(t_sc)

    in_dtype = logits_ref.dtype
    tn = tgt_ref.shape[0]
    tgt = tgt_ref[...]                               # (tn, 1) int32
    # Local (in-tile) target column: keeps the per-element work to a single
    # int compare + select (no global-offset add on the hot path).
    tgt_local = tgt - ci * tile_c                    # (tn, 1) int32

    neg_inf_raw = jnp.asarray(-jnp.inf, dtype=in_dtype)   # exact in bf16/f16/f32
    zero_raw = jnp.zeros((), dtype=in_dtype)

    # Hoisted lane iotas (JAX does not CSE broadcast_in_dim); at most two
    # distinct chunk widths (body + ragged tail chunk).
    iotas = {}

    def _lane_iota(width):
        if width not in iotas:
            iotas[width] = jax.lax.broadcasted_iota(jnp.int32, (tn, width), 1)
        return iotas[width]

    m_run = m_sc[...]
    s_run = s_sc[...]
    t_run = t_sc[...]

    # Chunked online-logsumexp over this class tile.  Static-offset slices are
    # cheap, and each chunk's big intermediates are immediately consumed by
    # (tn, 1) reductions, so nothing (tn, tile_c)-sized is materialized.
    for start in range(0, tile_c, chunk_c):
        width = min(chunk_c, tile_c - start)
        lane = _lane_iota(width)
        xc = logits_ref[:, pl.ds(start, width)]      # (tn, width), input dtype

        if mask_cols:
            # Ragged vocab tail: global columns >= n_classes hold garbage.
            col_ok = (ci * tile_c + start + lane) < n_classes
            xc = jnp.where(col_ok, xc, neg_inf_raw)

        # Row max + one-hot gather in the input dtype (lossless; bf16 VALU on
        # v6e/v7x).  Only the exp/accumulate path is upcast to f32.
        m_c = jnp.max(xc, axis=-1, keepdims=True).astype(jnp.float32)
        m_new = jnp.maximum(m_run, m_c)
        alpha = jnp.exp(m_run - m_new)               # exp(-inf)=0 on 1st chunk
        p = jnp.exp(xc.astype(jnp.float32) - m_new)
        s_run = alpha * s_run + jnp.sum(p, axis=-1, keepdims=True)

        onehot = lane == (tgt_local - start)         # hits in exactly one chunk
        t_run = t_run + jnp.sum(jnp.where(onehot, xc, zero_raw),
                                axis=-1, keepdims=True).astype(jnp.float32)
        m_run = m_new

    m_sc[...] = m_run
    s_sc[...] = s_run
    t_sc[...] = t_run

    @pl.when(ci == pl.num_programs(1) - 1)
    def _finalize():
        lse = m_run + jnp.log(s_run)
        valid = tgt != IGNORE_INDEX
        loss_ref[...] = jnp.where(valid, lse - t_run, 0.0)


@functools.partial(jax.jit,
                   static_argnames=("tile_n", "tile_c", "chunk_c",
                                    "vmem_limit_bytes"))
def cross_entropy(logits, targets, *, tile_n=128, tile_c=8192, chunk_c=512,
                  vmem_limit_bytes=None):
    """logits: (N, C) float (f32/bf16); targets: (N,) int class indices.

    Returns scalar f32: mean cross-entropy over non-ignored targets
    (PyTorch nn.CrossEntropyLoss defaults).  All-ignored batches return NaN
    (0/0), matching PyTorch.
    """
    n, c = logits.shape
    targets = targets.astype(jnp.int32)

    # --- tile-size normalization (respect the (8, 128) block constraint) -----
    tile_n = max(8, _round_up(int(tile_n), 8))
    tile_c = max(128, _round_up(int(tile_c), 128))

    tc = c if c <= tile_c else tile_c          # full-extent class block if small
    n_class_tiles = pl.cdiv(c, tc)             # ragged tail masked in-kernel
    mask_cols = (c % tc) != 0

    tn = _round_up(n, 8) if n <= tile_n else tile_n
    n_pad = _round_up(n, tn)                   # only targets/output get padded
    n_row_tiles = n_pad // tn

    cc = min(max(128, _round_up(int(chunk_c), 128)), tc)

    # --- targets: tiny pad so ragged/padded rows are cleanly ignored ---------
    tgt_p = jnp.full((n_pad, 1), IGNORE_INDEX, dtype=jnp.int32)
    tgt_p = tgt_p.at[:n, 0].set(targets)

    # --- scoped VMEM: logits double buffer + in-flight chunk temporaries -----
    if vmem_limit_bytes is None:
        itemsize = jnp.dtype(logits.dtype).itemsize
        need = (2 * tn * tc * itemsize         # logits double buffer
                + 4 * tn * cc * 4              # in-flight f32 chunk temporaries
                + 16 * tn * 4                  # targets / output / state
                + (2 << 20))                   # compiler-internal scratch slack
        cap = 40 * 1024 * 1024                 # safe on v7x (64 MiB physical)
        try:
            cap = min(cap, int(pltpu.get_tpu_info().vmem_capacity_bytes) // 2)
        except Exception:
            pass
        vmem_limit_bytes = int(min(max(need, 16 * 1024 * 1024), cap))

    kernel = functools.partial(_ce_kernel, n_classes=c, tile_c=tc,
                               chunk_c=cc, mask_cols=mask_cols)

    per_row = pl.pallas_call(
        kernel,
        out_shape=jax.ShapeDtypeStruct((n_pad, 1), jnp.float32),
        grid_spec=pltpu.PrefetchScalarGridSpec(
            num_scalar_prefetch=0,
            grid=(n_row_tiles, n_class_tiles),          # classes last (reduction)
            in_specs=[
                pl.BlockSpec((tn, tc), lambda i, j: (i, j)),   # logits tile
                pl.BlockSpec((tn, 1), lambda i, j: (i, 0)),    # per-row targets
            ],
            out_specs=pl.BlockSpec((tn, 1), lambda i, j: (i, 0)),
            scratch_shapes=[pltpu.VMEM((tn, 1), jnp.float32),   # running max
                            pltpu.VMEM((tn, 1), jnp.float32),   # running sum
                            pltpu.VMEM((tn, 1), jnp.float32)],  # target logit
        ),
        compiler_params=pltpu.CompilerParams(
            dimension_semantics=("parallel", "arbitrary"),
            vmem_limit_bytes=vmem_limit_bytes,
        ),
    )(logits, tgt_p)

    per_row = per_row[:n, 0]                            # drop padded rows
    valid = targets != IGNORE_INDEX
    count = jnp.sum(valid.astype(jnp.float32))
    # reduction='mean' over non-ignored targets; NaN if all ignored (as torch).
    return jnp.sum(per_row) / count
    # TODO(synk): label_smoothing>0, per-class weights, reduction='none'/'sum',
    # K-dim (N, C, d1, ...) inputs, and PyTorch's hard error on out-of-range
    # targets are not implemented (default cfg needs none of them).


def _reference(logits, targets):
    x = logits.astype(jnp.float32)
    lse = jax.scipy.special.logsumexp(x, axis=-1)
    tgt_clamped = jnp.clip(targets, 0, x.shape[-1] - 1)
    tgt_logit = jnp.take_along_axis(x, tgt_clamped[:, None], axis=-1)[:, 0]
    valid = targets != IGNORE_INDEX
    per_row = jnp.where(valid, lse - tgt_logit, 0.0)
    return jnp.sum(per_row) / jnp.sum(valid.astype(jnp.float32))


if __name__ == "__main__":
    key = jax.random.PRNGKey(0)
    k1, k2, k3 = jax.random.split(key, 3)

    # Case 1: single tile, full-extent classes (batch=8, num_classes=32), f32.
    N, C = 8, 32
    logits = jax.random.normal(k1, (N, C), dtype=jnp.float32)
    targets = jax.random.randint(k2, (N,), 0, C, dtype=jnp.int32)
    targets = targets.at[3].set(IGNORE_INDEX)           # exercise ignore_index
    loss = cross_entropy(logits, targets)
    jax.block_until_ready(loss)
    ref = _reference(logits, targets)
    assert jnp.allclose(loss, ref, rtol=1e-5, atol=1e-5), (loss, ref)

    # Case 2: row tiling + ragged class tiling (no logits pad), bf16 input.
    N2, C2 = 24, 300
    logits2 = jax.random.normal(k1, (N2, C2), dtype=jnp.bfloat16)
    targets2 = jax.random.randint(k2, (N2,), 0, C2, dtype=jnp.int32)
    targets2 = targets2.at[0].set(IGNORE_INDEX)
    loss2 = cross_entropy(logits2, targets2, tile_n=16, tile_c=128)
    jax.block_until_ready(loss2)
    ref2 = _reference(logits2, targets2)
    assert jnp.allclose(loss2, ref2, rtol=1e-2, atol=1e-2), (loss2, ref2)

    # Case 3: chunked inner loop + ragged last class tile (includes an
    # entirely-masked chunk), f32.
    N3, C3 = 16, 1300
    logits3 = jax.random.normal(k3, (N3, C3), dtype=jnp.float32)
    targets3 = jax.random.randint(k2, (N3,), 0, C3, dtype=jnp.int32)
    loss3 = cross_entropy(logits3, targets3, tile_c=1024, chunk_c=512)
    jax.block_until_ready(loss3)
    ref3 = _reference(logits3, targets3)
    assert jnp.allclose(loss3, ref3, rtol=1e-4, atol=1e-4), (loss3, ref3)

    print("KERNEL_OK")
</pallas_src>

<mosaic_0001>
module attributes {stable_mosaic.version = 11 : i64} {
  func.func @_ce_kernel(%arg0: i32, %arg1: i32, %arg2: memref<8x32xf32, #tpu.memory_space<vmem>>, %arg3: memref<8x1xi32, #tpu.memory_space<vmem>>, %arg4: memref<8x1xf32, #tpu.memory_space<vmem>>, %arg5: memref<8x1xf32, #tpu.memory_space<vmem>>, %arg6: memref<8x1xf32, #tpu.memory_space<vmem>>, %arg7: memref<8x1xf32, #tpu.memory_space<vmem>>) attributes {dimension_semantics = [#tpu.dimension_semantics<parallel>, #tpu.dimension_semantics<arbitrary>], iteration_bounds = array<i64: 1, 1>, scalar_prefetch = 0 : i64, scratch_operands = 3 : i64, tpu.core_type = #tpu.core_type<tc>, window_params = [{transform_indices = @transform_0, window_bounds = array<i64: 8, 32>}, {transform_indices = @transform_1, window_bounds = array<i64: 8, 1>}, {transform_indices = @transform_2, window_bounds = array<i64: 8, 1>}]} {
    %c0_i32 = arith.constant 0 : i32
    %0 = arith.cmpi eq, %arg1, %c0_i32 : i32
    %1 = arith.extui %0 : i1 to i32
    %c0_i32_0 = arith.constant 0 : i32
    %2 = arith.cmpi ne, %1, %c0_i32_0 : i32
    scf.if %2 {
      %cst_22 = arith.constant 0xFF800000 : f32
      %39 = vector.broadcast %cst_22 : f32 to vector<8x1xf32>
      %c0_23 = arith.constant 0 : index
      %c0_24 = arith.constant 0 : index
      %40 = vector.load %arg5[%c0_23, %c0_24] : memref<8x1xf32, #tpu.memory_space<vmem>>, vector<8x1xf32>
      tpu.vector_store %arg5[%c0_23, %c0_24], %39 {strides = array<i32>} : memref<8x1xf32, #tpu.memory_space<vmem>>, vector<8x1xf32>,
      %cst_25 = arith.constant 0.000000e+00 : f32
      %41 = vector.broadcast %cst_25 : f32 to vector<8x1xf32>
      %c0_26 = arith.constant 0 : index
      %c0_27 = arith.constant 0 : index
      %42 = vector.load %arg6[%c0_26, %c0_27] : memref<8x1xf32, #tpu.memory_space<vmem>>, vector<8x1xf32>
      tpu.vector_store %arg6[%c0_26, %c0_27], %41 {strides = array<i32>} : memref<8x1xf32, #tpu.memory_space<vmem>>, vector<8x1xf32>,
      %cst_28 = arith.constant 0.000000e+00 : f32
      %43 = vector.broadcast %cst_28 : f32 to vector<8x1xf32>
      %c0_29 = arith.constant 0 : index
      %c0_30 = arith.constant 0 : index
      %44 = vector.load %arg7[%c0_29, %c0_30] : memref<8x1xf32, #tpu.memory_space<vmem>>, vector<8x1xf32>
      tpu.vector_store %arg7[%c0_29, %c0_30], %43 {strides = array<i32>} : memref<8x1xf32, #tpu.memory_space<vmem>>, vector<8x1xf32>,
    } else {
    }
    %c0 = arith.constant 0 : index
    %c0_1 = arith.constant 0 : index
    %3 = vector.load %arg3[%c0, %c0_1] : memref<8x1xi32, #tpu.memory_space<vmem>>, vector<8x1xi32>
    %c32_i32 = arith.constant 32 : i32
    %4 = arith.muli %arg1, %c32_i32 : i32
    %5 = vector.broadcast %4 : i32 to vector<8x1xi32>
    %6 = arith.subi %3, %5 : vector<8x1xi32>
    %c0_2 = arith.constant 0 : index
    %c0_3 = arith.constant 0 : index
    %7 = vector.load %arg5[%c0_2, %c0_3] : memref<8x1xf32, #tpu.memory_space<vmem>>, vector<8x1xf32>
    %c0_4 = arith.constant 0 : index
    %c0_5 = arith.constant 0 : index
    %8 = vector.load %arg6[%c0_4, %c0_5] : memref<8x1xf32, #tpu.memory_space<vmem>>, vector<8x1xf32>
    %c0_6 = arith.constant 0 : index
    %c0_7 = arith.constant 0 : index
    %9 = vector.load %arg7[%c0_6, %c0_7] : memref<8x1xf32, #tpu.memory_space<vmem>>, vector<8x1xf32>
    %10 = tpu.iota {dimensions = array<i32: 1>} : vector<8x32xi32>
    %c0_8 = arith.constant 0 : index
    %c0_9 = arith.constant 0 : index
    %11 = vector.load %arg2[%c0_8, %c0_9] : memref<8x32xf32, #tpu.memory_space<vmem>>, vector<8x32xf32>
    %cst = arith.constant dense<0xFF800000> : vector<8xf32>
    %12 = vector.multi_reduction <maximumf>, %11, %cst [1] : vector<8x32xf32> to vector<8xf32>
    %13 = vector.shape_cast %12 : vector<8xf32> to vector<8x1xf32>
    %14 = arith.maximumf %7, %13 : vector<8x1xf32>
    %15 = arith.subf %7, %14 : vector<8x1xf32>
    %16 = math.exp %15 : vector<8x1xf32>
    %17 = vector.broadcast %14 : vector<8x1xf32> to vector<8x32xf32>
    %18 = arith.subf %11, %17 : vector<8x32xf32>
    %19 = math.exp %18 : vector<8x32xf32>
    %20 = arith.mulf %16, %8 : vector<8x1xf32>
    %cst_10 = arith.constant dense<0.000000e+00> : vector<8xf32>
    %21 = vector.multi_reduction <add>, %19, %cst_10 [1] : vector<8x32xf32> to vector<8xf32>
    %22 = vector.shape_cast %21 : vector<8xf32> to vector<8x1xf32>
    %23 = arith.addf %20, %22 : vector<8x1xf32>
    %c0_i32_11 = arith.constant 0 : i32
    %24 = vector.broadcast %c0_i32_11 : i32 to vector<8x1xi32>
    %25 = arith.subi %6, %24 : vector<8x1xi32>
    %26 = vector.broadcast %25 : vector<8x1xi32> to vector<8x32xi32>
    %27 = arith.cmpi eq, %10, %26 : vector<8x32xi32>
    %cst_12 = arith.constant 0.000000e+00 : f32
    %28 = vector.broadcast %cst_12 : f32 to vector<8x32xf32>
    %29 = arith.select %27, %11, %28 : vector<8x32xi1>, vector<8x32xf32>
    %cst_13 = arith.constant dense<0.000000e+00> : vector<8xf32>
    %30 = vector.multi_reduction <add>, %29, %cst_13 [1] : vector<8x32xf32> to vector<8xf32>
    %31 = vector.shape_cast %30 : vector<8xf32> to vector<8x1xf32>
    %32 = arith.addf %9, %31 : vector<8x1xf32>
    %c0_14 = arith.constant 0 : index
    %c0_15 = arith.constant 0 : index
    %33 = vector.load %arg5[%c0_14, %c0_15] : memref<8x1xf32, #tpu.memory_space<vmem>>, vector<8x1xf32>
    tpu.vector_store %arg5[%c0_14, %c0_15], %14 {strides = array<i32>} : memref<8x1xf32, #tpu.memory_space<vmem>>, vector<8x1xf32>,
    %c0_16 = arith.constant 0 : index
    %c0_17 = arith.constant 0 : index
    %34 = vector.load %arg6[%c0_16, %c0_17] : memref<8x1xf32, #tpu.memory_space<vmem>>, vector<8x1xf32>
    tpu.vector_store %arg6[%c0_16, %c0_17], %23 {strides = array<i32>} : memref<8x1xf32, #tpu.memory_space<vmem>>, vector<8x1xf32>,
    %c0_18 = arith.constant 0 : index
    %c0_19 = arith.constant 0 : index
    %35 = vector.load %arg7[%c0_18, %c0_19] : memref<8x1xf32, #tpu.memory_space<vmem>>, vector<8x1xf32>
    tpu.vector_store %arg7[%c0_18, %c0_19], %32 {strides = array<i32>} : memref<8x1xf32, #tpu.memory_space<vmem>>, vector<8x1xf32>,
    %c0_i32_20 = arith.constant 0 : i32
    %36 = arith.cmpi eq, %arg1, %c0_i32_20 : i32
    %37 = arith.extui %36 : i1 to i32
    %c0_i32_21 = arith.constant 0 : i32
    %38 = arith.cmpi ne, %37, %c0_i32_21 : i32
    scf.if %38 {
      %39 = math.log %23 : vector<8x1xf32>
      %40 = arith.addf %14, %39 : vector<8x1xf32>
      %c-100_i32 = arith.constant -100 : i32
      %41 = vector.broadcast %c-100_i32 : i32 to vector<8x1xi32>
      %42 = arith.cmpi ne, %3, %41 : vector<8x1xi32>
      %43 = arith.subf %40, %32 : vector<8x1xf32>
      %cst_22 = arith.constant 0.000000e+00 : f32
      %44 = vector.broadcast %cst_22 : f32 to vector<8x1xf32>
      %45 = arith.select %42, %43, %44 : vector<8x1xi1>, vector<8x1xf32>
      %c0_23 = arith.constant 0 : index
      %c0_24 = arith.constant 0 : index
      %46 = vector.load %arg4[%c0_23, %c0_24] : memref<8x1xf32, #tpu.memory_space<vmem>>, vector<8x1xf32>
      tpu.vector_store %arg4[%c0_23, %c0_24], %45 {strides = array<i32>} : memref<8x1xf32, #tpu.memory_space<vmem>>, vector<8x1xf32>,
    } else {
    }
    return
  }
  func.func @transform_0(%arg0: i32, %arg1: i32) -> (i32, i32) {
    %c0_i32 = arith.constant 0 : i32
    return %arg0, %arg1 : i32, i32
  }
  func.func @transform_1(%arg0: i32, %arg1: i32) -> (i32, i32) {
    %c0_i32 = arith.constant 0 : i32
    %c0_i32_0 = arith.constant 0 : i32
    return %arg0, %c0_i32 : i32, i32
  }
  func.func @transform_2(%arg0: i32, %arg1: i32) -> (i32, i32) {
    %c0_i32 = arith.constant 0 : i32
    %c0_i32_0 = arith.constant 0 : i32
    return %arg0, %c0_i32 : i32, i32
  }
}

</mosaic_0001>

<bundles_post_ra>
// kernel: cross_entropy.1
= control target key start
LH: loop header
LB: loop body
LE: loop exit
PB: predicated region body
PF: predicated region fallthrough
CT: control target
= control target key end

     0   :  { %vm29_vm0 = vcmask 261120   ;;  %vm15_vm1 = vcmask 7168   ;;  %v88_v1 = vmov -inf   ;;  %v89_v3 = vmov 0   ;;  %s125_s0 = inlined_call_operand.vmem [shape: f32[8,32], index: 0, kind: input, shape index: {}]   ;;  %s126_s1 = inlined_call_operand.vmem [shape: s32[8,1], index: 1, kind: input, shape index: {}]   ;;  %s127_s2 = inlined_call_operand.vmem [shape: f32[8,1], index: 2, kind: output, shape index: {}]  }
   0x1   :  { %v28_v0 = vld [vmem:[%s125_s0] sm:$0xff]  ;;  %16 = vst.msk [vmem:[#allocation2] sm:$0xff] %vm15_vm1, %v88_v1  ;;  %80 = vset.pattern.permute.xlu0 %v89_v3  ;;  %81 = vset.pattern.permute.xlu1 %v89_v3  ;;  %v90_v5 = vmov 0.0   ;;  %v26_v12 = vlaneseq }
   0x2   :  { %v30_v2 = vsel %vm29_vm0, %v28_v0, -inf  ;;  %v19_v4 = vld [vmem:[%s126_s1] sm:$0xff]  ;;  %17 = vst.msk [vmem:[#allocation3] sm:$0xff] %vm15_vm1, %v90_v5  ;;  %18 = vst.msk [vmem:[#allocation4] sm:$0xff] %vm15_vm1, %v90_v5 }
   0x3   :  { %31 = vmax.xlane.f32.xlu0 %v30_v2  ;;  %51 = vperm.xlu1 %81, %v19_v4   ;;  %v27_v13 = vand.u32 127, %v26_v12  ;;  %vm69_vm3 = vcmp.ne.s32.totalorder %v19_v4, 4294967196 }
   0x8   :  { %v23_v6 = vld [vmem:[#allocation2] sm:$0xff] }
   0x9   :  { %v24_v22 = vld [vmem:[#allocation3] sm:$0xff]  ;;  %v25_v26 = vld [vmem:[#allocation4] sm:$0xff] }
  0x82   :  { %v52_v14 = vpop.permute.xlu1 %51 }
  0x83   :  { %vm53_vm2 = vcmp.eq.s32.totalorder %v27_v13, %v52_v14 }
  0x84   :  { %v54_v16 = vsel %vm53_vm2, %v28_v0, 0.0 }
  0x85   :  { %v55_v18 = vsel %vm29_vm0, %v54_v16, 0.0 }
  0x90   :  { %v32_v7 = vpop.xlane.xlu0 %31 }
  0x91   :  { %v33_v8 = vmax.f32 %v23_v6, %v32_v7 }
  0x93   :  { %60 = vst.msk [vmem:[#allocation2] sm:$0xff] %vm15_vm1, %v33_v8  ;;  %39 = vperm.xlu0 %80, %v33_v8   ;;  %v34_v19 = vsub.f32 %v23_v6, %v33_v8 }
  0x95   :  { %v35_v20 = vmul.f32 1.442695, %v34_v19 }
 0x112   :  { %v40_v9 = vpop.permute.xlu0 %39 }
 0x113   :  { %v42_v10 = vsub.f32 %v28_v0, %v40_v9 }
 0x115   :  { %v43_v11 = vmul.f32 1.442695, %v42_v10 }
 0x117   :  { %82 = vpow2.f32 %v43_v11 }
 0x118   :  { %84 = vpow2.f32 %v35_v20 }
 0x121   :  { %v83_v15 = vpop.eup %82 }
 0x122   :  { %v46_v17 = vsel %vm29_vm0, %v83_v15, 0.0  ;;  %v85_v21 = vpop.eup %84 }
 0x123   :  { %47 = vadd.xlane.f32.xlu1 %v46_v17  ;;  %v45_v23 = vmul.f32 %v85_v21, %v24_v22 }
 0x127   :  { %56 = vadd.xlane.f32.xlu1 %v55_v18 }
 0x1b0   :  { %v48_v24 = vpop.xlane.xlu1 %47 }
 0x1b1   :  { %v49_v25 = vadd.f32 %v48_v24, %v45_v23 }
 0x1b3   :  { %61 = vst.msk [vmem:[#allocation3] sm:$0xff] %vm15_vm1, %v49_v25  ;;  %86 = vlog2.f32 %v49_v25 }
 0x1b4   :  { %v57_v27 = vpop.xlane.xlu1 %56 }
 0x1b5   :  { %v58_v28 = vadd.f32 %v57_v27, %v25_v26 }
 0x1b7   :  { %62 = vst.msk [vmem:[#allocation4] sm:$0xff] %vm15_vm1, %v58_v28 }
 0x1bd   :  { %v87_v29 = vpop.eup %86 }
 0x1be   :  { %v67_v30 = vmul.f32 0.6931472, %v87_v29 }
 0x1c0   :  { %v68_v31 = vadd.f32 %v67_v30, %v33_v8 }
 0x1c2   :  { %v70_v32 = vsub.f32 %v68_v31, %v58_v28 }
 0x1c4   :  { %v71_v33 = vsel %vm69_vm3, %v70_v32, 0.0 }
 0x1c5   :  { %72 = vst.msk [vmem:[%s127_s2] sm:$0xff] %vm15_vm1, %v71_v33 }

</bundles_post_ra>
